<compile_context>
chip_gen: v7x
topology: tpu7x:2x2x1
jax: 0.10.0
libtpu: 0.0.40
codegen_flags: <defaults>
</compile_context>

<pallas_src>
import jax
import jax.numpy as jnp
from jax import lax
from jax.experimental import pallas as pl
from jax.experimental.pallas import tpu as pltpu


def _round_up(x, m):
    return (x + m - 1) // m * m


def _critic_kernel(s_ref, a_ref, w1s_ref, w1a_ref, b1_ref, w2_ref, b2_ref,
                   w3_ref, b3_ref, o_ref):
    cdt = w1s_ref.dtype  # matmul operand dtype (bf16 on the fast MXU path, or f32)

    # Layer 1: fused "concat" -> two matmuls into one f32 accumulator, then bias + ReLU.
    h1 = jnp.dot(s_ref[...].astype(cdt), w1s_ref[...],
                 preferred_element_type=jnp.float32)
    h1 = h1 + jnp.dot(a_ref[...].astype(cdt), w1a_ref[...],
                      preferred_element_type=jnp.float32)
    h1 = jnp.maximum(h1 + b1_ref[...], 0.0)

    # Layer 2: Linear + ReLU (bf16 operands, f32 accumulation on the MXU).
    h2 = jnp.dot(h1.astype(cdt), w2_ref[...],
                 preferred_element_type=jnp.float32) + b2_ref[...]
    h2 = jnp.maximum(h2, 0.0)

    # Layer 3 (mid -> 1) as an NT matmul: (1, mid) x (tb, mid)^T -> (1, tb).
    # Result is lane-dense, so the store is a dense vst instead of masked 1-lane stores.
    q = lax.dot_general(w3_ref[...], h2, (((1,), (1,)), ((), ())),
                        preferred_element_type=jnp.float32)
    q = q + b3_ref[0]
    o_ref[...] = q.reshape(o_ref.shape).astype(o_ref.dtype)


def critic_forward(s, a, params, *, batch_tile=512, matmul_dtype=jnp.bfloat16):
    """Pallas implementation of Critic.forward(s, a): (B, S), (B, A) -> (B, 1)."""
    w1, b1, w2, b2, w3, b3 = params
    B, state_dim = s.shape
    action_dim = a.shape[1]
    mid_dim = w2.shape[0]

    # Split W1 once so the (B, S+A) concat never materializes in HBM; cast the big
    # matmul operands to the MXU-native dtype on the host (halves their HBM/VMEM traffic).
    w1s = w1[:state_dim].astype(matmul_dtype)
    w1a = w1[state_dim:].astype(matmul_dtype)
    w2c = w2.astype(matmul_dtype)
    b1r = b1.reshape(1, mid_dim).astype(jnp.float32)
    b2r = b2.reshape(1, mid_dim).astype(jnp.float32)
    w3_row = w3.reshape(1, mid_dim).astype(jnp.float32)
    b3_s = b3.reshape(1).astype(jnp.float32)

    # Balanced batch tiling: pick the number of tiles first, then the tile size,
    # so awkward batch sizes don't explode the padding (600 -> 608, not 1024).
    grid_n = pl.cdiv(B, batch_tile)
    if B >= 256 and grid_n < 2:
        grid_n = 2  # keep both v7x TensorCores busy for non-trivial batches
    tb = _round_up(pl.cdiv(B, grid_n), 8)
    b_pad = grid_n * tb
    if b_pad != B:
        s = jnp.pad(s, ((0, b_pad - B), (0, 0)))
        a = jnp.pad(a, ((0, b_pad - B), (0, 0)))

    # Explicit VMEM budget: single-buffered resident weights + double-buffered
    # s/a/out tiles + f32 intermediates + slack.
    wbytes = (w1s.size + w1a.size + w2c.size) * jnp.dtype(matmul_dtype).itemsize
    wbytes += (b1r.size + b2r.size + w3_row.size) * 4
    abytes = 2 * tb * (state_dim + action_dim) * s.dtype.itemsize  # s/a (double-buffered)
    abytes += 2 * tb * s.dtype.itemsize                            # out (double-buffered)
    ibytes = 2 * tb * mid_dim * 4                                  # h1 / h2 (f32)
    vmem_limit = int(min(max(wbytes + abytes + ibytes + (4 << 20), 16 << 20), 100 << 20))

    out = pl.pallas_call(
        _critic_kernel,
        out_shape=jax.ShapeDtypeStruct((grid_n, 1, tb), s.dtype),
        grid=(grid_n,),
        in_specs=[
            pl.BlockSpec((tb, state_dim), lambda i: (i, 0)),    # s batch tile (pipelined)
            pl.BlockSpec((tb, action_dim), lambda i: (i, 0)),   # a batch tile (pipelined)
            # Weights/biases: whole-array VMEM residents -> single buffer, loaded once,
            # no per-tile re-DMA and no double-buffering overhead.
            pl.BlockSpec(memory_space=pltpu.MemorySpace.VMEM),  # W1[:S]
            pl.BlockSpec(memory_space=pltpu.MemorySpace.VMEM),  # W1[S:]
            pl.BlockSpec(memory_space=pltpu.MemorySpace.VMEM),  # b1
            pl.BlockSpec(memory_space=pltpu.MemorySpace.VMEM),  # W2
            pl.BlockSpec(memory_space=pltpu.MemorySpace.VMEM),  # b2
            pl.BlockSpec(memory_space=pltpu.MemorySpace.VMEM),  # w3 row
            pl.BlockSpec(memory_space=pltpu.MemorySpace.SMEM),  # b3 scalar
        ],
        out_specs=pl.BlockSpec((1, 1, tb), lambda i: (i, 0, 0)),  # lane-dense (1, tb) slab
        compiler_params=pltpu.CompilerParams(
            dimension_semantics=("parallel",),
            vmem_limit_bytes=vmem_limit),
    )(s, a, w1s, w1a, b1r, w2c, b2r, w3_row, b3_s)
    # TODO(synk): for production mid_dim >= 4096 f32 (>= 8192 bf16) W2 no longer fits
    # VMEM-resident on v7x (64 MiB); add an "arbitrary" grid axis N-tiling W2/w3 with a
    # pl.when-init/finalize accumulator instead of the whole-array resident spec.
    return out.reshape(b_pad, 1)[:B]


def init_critic_params(key, state_dim, action_dim, mid_dim, dtype=jnp.float32):
    """Deterministic init mirroring nn.Linear's U(-1/sqrt(fan_in), 1/sqrt(fan_in))."""
    in_dim = state_dim + action_dim
    ks = jax.random.split(key, 6)

    def lin(kw, kb, fan_in, fan_out):
        bound = 1.0 / jnp.sqrt(jnp.asarray(fan_in, dtype))
        w = jax.random.uniform(kw, (fan_in, fan_out), dtype, -bound, bound)
        b = jax.random.uniform(kb, (1, fan_out), dtype, -bound, bound)
        return w, b

    w1, b1 = lin(ks[0], ks[1], in_dim, mid_dim)
    w2, b2 = lin(ks[2], ks[3], mid_dim, mid_dim)
    w3, b3 = lin(ks[4], ks[5], mid_dim, 1)
    return (w1, b1, w2, b2, w3, b3)


def _reference(s, a, params):
    w1, b1, w2, b2, w3, b3 = params
    x = jnp.concatenate([s, a], axis=1)
    h = jnp.maximum(x @ w1 + b1, 0.0)
    h = jnp.maximum(h @ w2 + b2, 0.0)
    return h @ w3 + b3


if __name__ == "__main__":
    state_dim, action_dim, mid_dim = 16, 16, 32

    key = jax.random.PRNGKey(0)
    params = init_critic_params(jax.random.fold_in(key, 0), state_dim, action_dim, mid_dim)

    # batch=8: single-tile demo shape; batch=600: exercises balanced tiling (2 x 304) + padding.
    for batch in (8, 600):
        k_s, k_a = jax.random.split(jax.random.fold_in(key, batch))
        s = jax.random.normal(k_s, (batch, state_dim), jnp.float32)
        a = jax.random.normal(k_a, (batch, action_dim), jnp.float32)
        q_ref = _reference(s, a, params)

        # Exact f32 path: tight check against the f32 reference.
        q32 = critic_forward(s, a, params, matmul_dtype=jnp.float32)
        jax.block_until_ready(q32)
        assert q32.shape == (batch, 1)
        assert jnp.allclose(q32, q_ref, atol=1e-4, rtol=1e-4), float(
            jnp.max(jnp.abs(q32 - q_ref)))

        # Default bf16 MXU fast path: looser tolerance for bf16 operand rounding.
        qbf = critic_forward(s, a, params)
        jax.block_until_ready(qbf)
        assert qbf.shape == (batch, 1)
        assert jnp.allclose(qbf, q_ref, atol=5e-2, rtol=5e-2), float(
            jnp.max(jnp.abs(qbf - q_ref)))

    print("KERNEL_OK")
</pallas_src>

<mosaic_0001>
module attributes {stable_mosaic.version = 11 : i64} {
  func.func @_critic_kernel(%arg0: i32, %arg1: memref<8x16xf32, #tpu.memory_space<vmem>>, %arg2: memref<8x16xf32, #tpu.memory_space<vmem>>, %arg3: memref<16x32xf32, #tpu.memory_space<vmem>>, %arg4: memref<16x32xf32, #tpu.memory_space<vmem>>, %arg5: memref<1x32xf32, #tpu.memory_space<vmem>>, %arg6: memref<32x32xf32, #tpu.memory_space<vmem>>, %arg7: memref<1x32xf32, #tpu.memory_space<vmem>>, %arg8: memref<1x32xf32, #tpu.memory_space<vmem>>, %arg9: memref<1xf32, #tpu.memory_space<smem>>, %arg10: memref<1x1x8xf32, #tpu.memory_space<vmem>>) attributes {dimension_semantics = [#tpu.dimension_semantics<parallel>], iteration_bounds = array<i64: 1>, scalar_prefetch = 0 : i64, scratch_operands = 0 : i64, tpu.core_type = #tpu.core_type<tc>, window_params = [{transform_indices = @transform_0, window_bounds = array<i64: 8, 16>}, {transform_indices = @transform_1, window_bounds = array<i64: 8, 16>}, {pipeline_mode = #tpu.pipeline_mode<synchronous>, transform_indices = @transform_2, window_bounds = array<i64: 16, 32>}, {pipeline_mode = #tpu.pipeline_mode<synchronous>, transform_indices = @transform_3, window_bounds = array<i64: 16, 32>}, {pipeline_mode = #tpu.pipeline_mode<synchronous>, transform_indices = @transform_4, window_bounds = array<i64: 1, 32>}, {pipeline_mode = #tpu.pipeline_mode<synchronous>, transform_indices = @transform_5, window_bounds = array<i64: 32, 32>}, {pipeline_mode = #tpu.pipeline_mode<synchronous>, transform_indices = @transform_6, window_bounds = array<i64: 1, 32>}, {pipeline_mode = #tpu.pipeline_mode<synchronous>, transform_indices = @transform_7, window_bounds = array<i64: 1, 32>}, {transform_indices = @transform_8, window_bounds = array<i64: 1>}, {transform_indices = @transform_9, window_bounds = array<i64: 1, 1, 8>}]} {
    %c0 = arith.constant 0 : index
    %c0_0 = arith.constant 0 : index
    %0 = vector.load %arg1[%c0, %c0_0] : memref<8x16xf32, #tpu.memory_space<vmem>>, vector<8x16xf32>
    %c0_1 = arith.constant 0 : index
    %c0_2 = arith.constant 0 : index
    %1 = vector.load %arg3[%c0_1, %c0_2] : memref<16x32xf32, #tpu.memory_space<vmem>>, vector<16x32xf32>
    %cst = arith.constant dense<0.000000e+00> : vector<8x32xf32>
    %2 = tpu.matmul %0, %1, %cst {dimension_numbers = #tpu.dot_dimension_numbers<[1], [0], [0], [1], [0, 0, 1, 1], [], []>} : vector<8x16xf32>, vector<16x32xf32>, vector<8x32xf32> -> vector<8x32xf32>
    %c0_3 = arith.constant 0 : index
    %c0_4 = arith.constant 0 : index
    %3 = vector.load %arg2[%c0_3, %c0_4] : memref<8x16xf32, #tpu.memory_space<vmem>>, vector<8x16xf32>
    %c0_5 = arith.constant 0 : index
    %c0_6 = arith.constant 0 : index
    %4 = vector.load %arg4[%c0_5, %c0_6] : memref<16x32xf32, #tpu.memory_space<vmem>>, vector<16x32xf32>
    %cst_7 = arith.constant dense<0.000000e+00> : vector<8x32xf32>
    %5 = tpu.matmul %3, %4, %cst_7 {dimension_numbers = #tpu.dot_dimension_numbers<[1], [0], [0], [1], [0, 0, 1, 1], [], []>} : vector<8x16xf32>, vector<16x32xf32>, vector<8x32xf32> -> vector<8x32xf32>
    %6 = arith.addf %2, %5 : vector<8x32xf32>
    %c0_8 = arith.constant 0 : index
    %c0_9 = arith.constant 0 : index
    %7 = vector.load %arg5[%c0_8, %c0_9] : memref<1x32xf32, #tpu.memory_space<vmem>>, vector<1x32xf32>
    %8 = vector.broadcast %7 : vector<1x32xf32> to vector<8x32xf32>
    %9 = arith.addf %6, %8 : vector<8x32xf32>
    %cst_10 = arith.constant 0.000000e+00 : f32
    %10 = vector.broadcast %cst_10 : f32 to vector<8x32xf32>
    %11 = arith.maximumf %9, %10 : vector<8x32xf32>
    %c0_11 = arith.constant 0 : index
    %c0_12 = arith.constant 0 : index
    %12 = vector.load %arg6[%c0_11, %c0_12] : memref<32x32xf32, #tpu.memory_space<vmem>>, vector<32x32xf32>
    %cst_13 = arith.constant dense<0.000000e+00> : vector<8x32xf32>
    %13 = tpu.matmul %11, %12, %cst_13 {dimension_numbers = #tpu.dot_dimension_numbers<[1], [0], [0], [1], [0, 0, 1, 1], [], []>} : vector<8x32xf32>, vector<32x32xf32>, vector<8x32xf32> -> vector<8x32xf32>
    %c0_14 = arith.constant 0 : index
    %c0_15 = arith.constant 0 : index
    %14 = vector.load %arg7[%c0_14, %c0_15] : memref<1x32xf32, #tpu.memory_space<vmem>>, vector<1x32xf32>
    %15 = vector.broadcast %14 : vector<1x32xf32> to vector<8x32xf32>
    %16 = arith.addf %13, %15 : vector<8x32xf32>
    %cst_16 = arith.constant 0.000000e+00 : f32
    %17 = vector.broadcast %cst_16 : f32 to vector<8x32xf32>
    %18 = arith.maximumf %16, %17 : vector<8x32xf32>
    %c0_17 = arith.constant 0 : index
    %c0_18 = arith.constant 0 : index
    %19 = vector.load %arg8[%c0_17, %c0_18] : memref<1x32xf32, #tpu.memory_space<vmem>>, vector<1x32xf32>
    %cst_19 = arith.constant dense<0.000000e+00> : vector<1x8xf32>
    %20 = tpu.matmul %19, %18, %cst_19 {dimension_numbers = #tpu.dot_dimension_numbers<[1], [1], [0], [0], [0, 0, 1, 0], [], []>} : vector<1x32xf32>, vector<8x32xf32>, vector<1x8xf32> -> vector<1x8xf32>
    %c0_20 = arith.constant 0 : index
    %21 = memref.load %arg9[%c0_20] : memref<1xf32, #tpu.memory_space<smem>>
    %22 = vector.broadcast %21 : f32 to vector<1x8xf32>
    %23 = arith.addf %20, %22 : vector<1x8xf32>
    %24 = vector.shape_cast %23 : vector<1x8xf32> to vector<1x1x8xf32>
    %c0_21 = arith.constant 0 : index
    %c0_22 = arith.constant 0 : index
    %c0_23 = arith.constant 0 : index
    %25 = vector.load %arg10[%c0_21, %c0_22, %c0_23] : memref<1x1x8xf32, #tpu.memory_space<vmem>>, vector<1x1x8xf32>
    tpu.vector_store %arg10[%c0_21, %c0_22, %c0_23], %24 {strides = array<i32>} : memref<1x1x8xf32, #tpu.memory_space<vmem>>, vector<1x1x8xf32>,
    return
  }
  func.func @transform_0(%arg0: i32) -> (i32, i32) {
    %c0_i32 = arith.constant 0 : i32
    %c0_i32_0 = arith.constant 0 : i32
    return %arg0, %c0_i32 : i32, i32
  }
  func.func @transform_1(%arg0: i32) -> (i32, i32) {
    %c0_i32 = arith.constant 0 : i32
    %c0_i32_0 = arith.constant 0 : i32
    return %arg0, %c0_i32 : i32, i32
  }
  func.func @transform_2(%arg0: i32) -> (i32, i32) {
    %c0_i32 = arith.constant 0 : i32
    %c0_i32_0 = arith.constant 0 : i32
    %c0_i32_1 = arith.constant 0 : i32
    return %c0_i32, %c0_i32_0 : i32, i32
  }
  func.func @transform_3(%arg0: i32) -> (i32, i32) {
    %c0_i32 = arith.constant 0 : i32
    %c0_i32_0 = arith.constant 0 : i32
    %c0_i32_1 = arith.constant 0 : i32
    return %c0_i32, %c0_i32_0 : i32, i32
  }
  func.func @transform_4(%arg0: i32) -> (i32, i32) {
    %c0_i32 = arith.constant 0 : i32
    %c0_i32_0 = arith.constant 0 : i32
    %c0_i32_1 = arith.constant 0 : i32
    return %c0_i32, %c0_i32_0 : i32, i32
  }
  func.func @transform_5(%arg0: i32) -> (i32, i32) {
    %c0_i32 = arith.constant 0 : i32
    %c0_i32_0 = arith.constant 0 : i32
    %c0_i32_1 = arith.constant 0 : i32
    return %c0_i32, %c0_i32_0 : i32, i32
  }
  func.func @transform_6(%arg0: i32) -> (i32, i32) {
    %c0_i32 = arith.constant 0 : i32
    %c0_i32_0 = arith.constant 0 : i32
    %c0_i32_1 = arith.constant 0 : i32
    return %c0_i32, %c0_i32_0 : i32, i32
  }
  func.func @transform_7(%arg0: i32) -> (i32, i32) {
    %c0_i32 = arith.constant 0 : i32
    %c0_i32_0 = arith.constant 0 : i32
    %c0_i32_1 = arith.constant 0 : i32
    return %c0_i32, %c0_i32_0 : i32, i32
  }
  func.func @transform_8(%arg0: i32) -> i32 {
    %c0_i32 = arith.constant 0 : i32
    %c0_i32_0 = arith.constant 0 : i32
    return %c0_i32 : i32
  }
  func.func @transform_9(%arg0: i32) -> (i32, i32, i32) {
    %c0_i32 = arith.constant 0 : i32
    %c0_i32_0 = arith.constant 0 : i32
    %c0_i32_1 = arith.constant 0 : i32
    return %arg0, %c0_i32, %c0_i32_0 : i32, i32, i32
  }
}

</mosaic_0001>

<bundles_post_ra>
// kernel: tpu_custom_call.1
= control target key start
LH: loop header
LB: loop body
LE: loop exit
PB: predicated region body
PF: predicated region fallthrough
CT: control target
= control target key end

     0   :  { %15 = vsyncpa [#allocation4], 0  ;;  %s815_s0 = inlined_call_operand.hbm [shape: f32[8,16], index: 0, kind: input, shape index: {}]   ;;  %s816_s1 = inlined_call_operand.hbm [shape: f32[8,16], index: 1, kind: input, shape index: {}]   ;;  %s817_s2 = inlined_call_operand.hbm [shape: f32[16,32], index: 2, kind: input, shape index: {}]   ;;  %s818_s3 = inlined_call_operand.hbm [shape: f32[16,32], index: 3, kind: input, shape index: {}]   ;;  %s819_s4 = inlined_call_operand.vmem [shape: f32[1,32], index: 4, kind: input, shape index: {}]   ;;  %s820_s5 = inlined_call_operand.hbm [shape: f32[32,32], index: 5, kind: input, shape index: {}]   ;;  %s821_s6 = inlined_call_operand.vmem [shape: f32[1,32], index: 6, kind: input, shape index: {}]   ;;  %s822_s7 = inlined_call_operand.vmem [shape: f32[1,32], index: 7, kind: input, shape index: {}]   ;;  %s823_s8 = inlined_call_operand.<no memory space> [shape: f32[1], index: 8, kind: input, shape index: {}]   ;;  %s824_s9 = inlined_call_operand.hbm [shape: f32[1,1,8], index: 9, kind: output, shape index: {}]  }
   0x1   :  { %16 = vsyncpa [#allocation7], 0 }
   0x2   :  { %17 = vsyncpa [#allocation10], 0 }
   0x3   :  { %18 = vsyncpa [#allocation5], 0  ;;  %s657_s30 = smov [#allocation6]   ;;  %s517_s13 = scalar_lea.hbm %s816_s1, 128 }
   0x4   :  { %s35_s10 = sshll.u32 %s657_s30, 4  ;;  %p518_p0 = scmp.ne.s32.totalorder %s816_s1, %s517_s13  ;;  %s36_s10 = int_to_ptr.vmem [resolvable:$true] %s35_s10 }
   0x5   :  { %p521_p1 = scmp.lt.u32.totalorder %s517_s13, %s816_s1 }
   0x7   :  { %p523_p2 = pnand %p521_p1, %p518_p0 }
   0x9   :  { %526 = shalt.err (!%p523_p2)
}
   0xa   :  { %s527_s18 = scalar_lea.vmem %s36_s10, 128  ;;  %p532_p4 = scmp.lt.s32.totalorder %s36_s10, %s36_s10 }
   0xb   :  { %p528_p3 = scmp.ne.s32.totalorder %s36_s10, %s527_s18  ;;  %p533_p5 = scmp.lt.s32.totalorder %s527_s18, %s527_s18 }
   0xd   :  { %p534_p6 = por %p533_p5, %p532_p4 }
   0xf   :  { %p535_p7 = pnand %p534_p6, %p528_p3 }
  0x11   :  { %538 = shalt.err (!%p535_p7)
}
  0x12   :  { %38 = dma.hbm_to_vmem [thread:$0]  %s816_s1, 128, %s36_s10, [#allocation7]  }
  0x13   :  { %s658_s21 = smov [#allocation9]   ;;  %s659_s23 = smov [#allocation3]  }
  0x14   :  { %s56_s22 = sshll.u32 %s658_s21, 4  ;;  %s25_s24 = sshll.u32 %s659_s23, 4  ;;  %s57_s22 = int_to_ptr.vmem [resolvable:$true] %s56_s22  ;;  %s26_s24 = int_to_ptr.vmem [resolvable:$true] %s25_s24 }
  0x15   :  { %s539_s27 = scalar_lea.hbm %s818_s3, 256 }
  0x16   :  { %p540_p8 = scmp.ne.s32.totalorder %s818_s3, %s539_s27  ;;  %p543_p9 = scmp.lt.u32.totalorder %s539_s27, %s818_s3 }
  0x18   :  { %p545_p10 = pnand %p543_p9, %p540_p8 }
  0x1a   :  { %548 = shalt.err (!%p545_p10)
}
  0x1b   :  { %s549_s1 = scalar_lea.vmem %s57_s22, 256  ;;  %p554_p12 = scmp.lt.s32.totalorder %s57_s22, %s57_s22 }
  0x1c   :  { %p550_p11 = scmp.ne.s32.totalorder %s57_s22, %s549_s1  ;;  %p555_p13 = scmp.lt.s32.totalorder %s549_s1, %s549_s1 }
  0x1e   :  { %p556_p0 = por %p555_p13, %p554_p12 }
  0x20   :  { %p557_p1 = pnand %p556_p0, %p550_p11 }
  0x22   :  { %560 = shalt.err (!%p557_p1)
}
  0x23   :  { %s660_s10 = smov 128   ;;  %s661_s12 = smov 8  }
  0x24   :  { %62 = dma.hbm_to_vmem [thread:$0]  %s818_s3, 256, %s57_s22, [#allocation10], %s660_s10, %s660_s10, %s661_s12  }
  0x25   :  { %s561_s17 = scalar_lea.hbm %s815_s0, 128 }
  0x26   :  { %p562_p2 = scmp.ne.s32.totalorder %s815_s0, %s561_s17  ;;  %p565_p3 = scmp.lt.u32.totalorder %s561_s17, %s815_s0 }
  0x28   :  { %p567_p4 = pnand %p565_p3, %p562_p2 }
  0x2a   :  { %570 = shalt.err (!%p567_p4)
}
  0x2b   :  { %s571_s23 = scalar_lea.vmem %s26_s24, 128  ;;  %p576_p6 = scmp.lt.s32.totalorder %s26_s24, %s26_s24 }
  0x2c   :  { %p572_p5 = scmp.ne.s32.totalorder %s26_s24, %s571_s23  ;;  %p577_p7 = scmp.lt.s32.totalorder %s571_s23, %s571_s23 }
  0x2e   :  { %p578_p8 = por %p577_p7, %p576_p6 }
  0x30   :  { %p579_p9 = pnand %p578_p8, %p572_p5 }
  0x32   :  { %582 = shalt.err (!%p579_p9)
}
  0x33   :  { %28 = dma.hbm_to_vmem [thread:$0]  %s815_s0, 128, %s26_s24, [#allocation4]  }
  0x34   :  { %s662_s25 = smov [#allocation8]   ;;  %s663_s27 = smov [#allocation11]  }
  0x35   :  { %s44_s26 = sshll.u32 %s662_s25, 4  ;;  %s70_s28 = sshll.u32 %s663_s27, 4  ;;  %s45_s26 = int_to_ptr.vmem [resolvable:$true] %s44_s26  ;;  %s71_s28 = int_to_ptr.vmem [resolvable:$true] %s70_s28 }
  0x36   :  { %s583_s11 = scalar_lea.hbm %s817_s2, 256 }
  0x37   :  { %p584_p10 = scmp.ne.s32.totalorder %s817_s2, %s583_s11  ;;  %p587_p11 = scmp.lt.u32.totalorder %s583_s11, %s817_s2 }
  0x39   :  { %p589_p12 = pnand %p587_p11, %p584_p10 }
  0x3b   :  { %592 = shalt.err (!%p589_p12)
}
  0x3c   :  { %s593_s0 = scalar_lea.vmem %s45_s26, 256  ;;  %p598_p0 = scmp.lt.s32.totalorder %s45_s26, %s45_s26 }
  0x3d   :  { %p594_p13 = scmp.ne.s32.totalorder %s45_s26, %s593_s0  ;;  %p599_p1 = scmp.lt.s32.totalorder %s593_s0, %s593_s0 }
  0x3f   :  { %p600_p2 = por %p599_p1, %p598_p0 }
  0x41   :  { %p601_p3 = pnand %p600_p2, %p594_p13 }
  0x43   :  { %604 = shalt.err (!%p601_p3)
}
  0x44   :  { %50 = dma.hbm_to_vmem [thread:$0]  %s817_s2, 256, %s45_s26, [#allocation7], %s660_s10, %s660_s10, %s661_s12  }
  0x45   :  { %s605_s19 = scalar_lea.hbm %s820_s5, 512 }
  0x46   :  { %p606_p4 = scmp.ne.s32.totalorder %s820_s5, %s605_s19  ;;  %p609_p5 = scmp.lt.u32.totalorder %s605_s19, %s820_s5 }
  0x48   :  { %p611_p6 = pnand %p609_p5, %p606_p4 }
  0x4a   :  { %614 = shalt.err (!%p611_p6)
}
  0x4b   :  { %s615_s22 = scalar_lea.vmem %s71_s28, 512  ;;  %p620_p8 = scmp.lt.s32.totalorder %s71_s28, %s71_s28 }
  0x4c   :  { %p616_p7 = scmp.ne.s32.totalorder %s71_s28, %s615_s22  ;;  %p621_p9 = scmp.lt.s32.totalorder %s615_s22, %s615_s22 }
  0x4e   :  { %p622_p10 = por %p621_p9, %p620_p8 }
  0x50   :  { %p623_p11 = pnand %p622_p10, %p616_p7 }
  0x52   :  { %626 = shalt.err (!%p623_p11)
}
  0x53   :  { %76 = dma.hbm_to_vmem [thread:$0]  %s820_s5, 512, %s71_s28, [#allocation10], %s660_s10, %s660_s10, %s661_s12  }
  0x54   :  { %649 = dma.done.wait [#allocation4], 128  }
  0x55   :  { %650 = vsyncadd [#allocation4], 4294967168 }
  0x56   :  { %651 = dma.done.wait [#allocation7], 384  }
  0x57   :  { %652 = vsyncadd [#allocation7], 4294966912 }
  0x58   :  { %653 = dma.done.wait [#allocation10], 768  }
  0x59   :  { %654 = vsyncadd [#allocation10], 4294966528  ;;  %v664_v0 = vmov 0.0|0.0   ;;  %vm665_vm0 = vmmov 0   ;;  %v666_v1 = vmov 0.0   ;;  %v102_v2 = vld [vmem:[#allocation9] sm:$0xff]  ;;  %v348_v30 = vstv %s823_s8 }
  0x5a   :  { %494 = vmatprep.subr.bf16.mxu0 %v664_v0  ;;  %497 = vmatprep.subr.bf16.mxu1 %v664_v0  ;;  %v103_v3 = vld [vmem:[#allocation9 + $0x8] sm:$0xff]  ;;  %v99_v4 = vld [vmem:[#allocation8] sm:$0xff]  ;;  %v100_v6 = vld [vmem:[#allocation8 + $0x8] sm:$0xff]  ;;  %vm104_vm1 = vcmask 130048   ;;  %vm271_vm2 = vcmask 261120   ;;  %s667_s30 = smov [#allocation12]  }
  0x5b   :  { %468 = vmatprep.mubr.msk.f32.mxu0 %vm665_vm0, %v666_v1  ;;  %475 = vmatprep.mubr.msk.f32.mxu1 %vm665_vm0, %v666_v1  ;;  %v495_v5 = vpack.c.bf16 %v103_v3, %v102_v2  ;;  %v498_v7 = vpack.c.bf16 %v100_v6, %v99_v4  ;;  %v101_v8 = vld [vmem:[#allocation6] sm:$0xff]  ;;  %v98_v9 = vld [vmem:[#allocation3] sm:$0xff]  ;;  %v260_v10 = vld [vmem:[#allocation11] sm:$0xff]  ;;  %s433_s11 = sshll.u32 %s667_s30, 4  ;;  %vm425_vm3 = vcmask 57344   ;;  %s434_s11 = int_to_ptr.vmem [resolvable:$true] %s433_s11 }
  0x5c   :  { %v261_v11 = vld [vmem:[#allocation11 + $0x8] sm:$0xff]  ;;  %v262_v13 = vld [vmem:[#allocation11 + $0x10] sm:$0xff]  ;;  %v263_v14 = vld [vmem:[#allocation11 + $0x18] sm:$0xff]  ;;  %s631_s1 = scalar_lea.vmem %s434_s11, 32  ;;  %p632_p13 = scmp.lt.s32.totalorder %s434_s11, %s434_s11 }
  0x5d   :  { %496 = vmatpush3.bf16.msra.mxu0 %v495_v5  ;;  %499 = vmatpush3.bf16.msra.mxu1 %v498_v7  ;;  %v501_v12 = vpack.c.bf16 %v261_v11, %v260_v10  ;;  %v504_v15 = vpack.c.bf16 %v263_v14, %v262_v13  ;;  %v446_v18 = vld [vmem:[%s819_s4] ss:$0 sm:$0xff] }
  0x5e   :  { %500 = vmatprep.subr.bf16.mxu0 %v664_v0  ;;  %489 = vmatprep.subr.mxu1 %v666_v1  ;;  %v447_v24 = vld [vmem:[%s821_s6] ss:$0 sm:$0xff]  ;;  %s627_s6 = scalar_lea.vmem %s434_s11, 16 }
  0x5f   :  { %v346_v29 = vld [vmem:[%s822_s7] sm:$0x1]  ;;  %p628_p12 = scmp.ne.s32.totalorder %s434_s11, %s627_s6  ;;  %p633_p0 = scmp.lt.s32.totalorder %s631_s1, %s627_s6 }
  0x60   :  { %469 = vmatmul.mubr.msk.f32.vlgmr.msra.gmra.mrb[0].mxu0 %vm104_vm1, %v101_v8  ;;  %476 = vmatmul.mubr.msk.f32.vlgmr.msra.gmra.mrb[0].mxu1 %vm104_vm1, %v98_v9 }
  0x61   :  { %486 = vmatprep.mubr.msk.f32.mxu0 %vm665_vm0, %v666_v1  ;;  %491 = vmatprep.mubr.msk.f32.mxu1 %vm665_vm0, %v666_v1  ;;  %p634_p1 = por %p633_p0, %p632_p13 }
  0x62   :  { %502 = vmatpush3.bf16.msra.mxu0 %v501_v12 }
  0x63   :  { %503 = vmatprep.subr.bf16.mxu0 %v664_v0  ;;  %p635_p2 = pnand %p634_p1, %p628_p12 }
  0x66   :  { %505 = vmatpush3.bf16.msra.mxu0 %v504_v15 }
 0x133   :  { %v174_v16 = vpop.f32.mrb[0].mxu0  ;;  %v247_v17 = vpop.f32.mrb[0].mxu1 }
 0x134   :  { %v470_v19 = vpop.f32.mrb[1].mxu0  ;;  %v248_v20 = vadd.f32 %v247_v17, %v174_v16  ;;  %v477_v21 = vpop.f32.mrb[1].mxu1 }
 0x136   :  { %v258_v22 = vadd.f32 %v446_v18, %v248_v20 }
 0x138   :  { %v259_v23 = vmax.f32 %v258_v22, 0.0 }
 0x13a   :  { %487 = vmatmul.mubr.msk.f32.vlgmr.msra.gmra.mrb[2].mxu0 %vm271_vm2, %v259_v23 }
 0x20d   :  { %v341_v25 = vpop.f32.mrb[2].mxu0 }
 0x20e   :  { %v342_v26 = vadd.f32 %v447_v24, %v341_v25  ;;  %v488_v27 = vpop.f32.mrb[3].mxu0 }
 0x210   :  { %v345_v28 = vmax.f32 %v342_v26, 0.0 }
 0x212   :  { %490 = vmatpush3.xpose.msk.msra.mxu1 %vm271_vm2, %v345_v28 }
 0x215   :  { %492 = vmatmul.mubr.msk.f32.vlgmr.msra.gmra.mrb[2].mxu1 %vm271_vm2, %v346_v29 }
 0x2e8   :  { %v421_v31 = vpop.f32.mrb[2].mxu1 }
 0x2e9   :  { %v422_v32 = vadd.f32 %v421_v31, %v348_v30  ;;  %v493_v33 = vpop.f32.mrb[3].mxu1 }
 0x2eb   :  { %426 = vst.msk [vmem:[#allocation12] sm:$0x1] %vm425_vm3, %v422_v32 }
 0x2ec   :  { %638 = shalt.err (!%p635_p2)
}
 0x2ed   :  { %s639_s8 = scalar_lea.hbm %s824_s9, 16 }
 0x2ee   :  { %p640_p3 = scmp.ne.s32.totalorder %s824_s9, %s639_s8  ;;  %p643_p4 = scmp.lt.u32.totalorder %s639_s8, %s824_s9 }
 0x2f0   :  { %p645_p5 = pnand %p643_p4, %p640_p3 }
 0x2f2   :  { %648 = shalt.err (!%p645_p5)
}
 0x2f3   :  { %436 = dma.vmem_to_hbm [thread:$0]  %s434_s11, 16, %s824_s9, [#allocation5]  }
 0x2f4   :  { %655 = dma.done.wait [#allocation5], 16  }
 0x2f5   :  { %656 = vsyncadd [#allocation5], 4294967280 }
 0x2f6   :  { %440 = vsyncpa [#allocation4], 1 }
 0x2f7   :  { %441 = vsyncpa [#allocation7], 1 }
 0x2f8   :  { %442 = vsyncpa [#allocation10], 1 }
 0x2f9   :  { %443 = vsyncpa [#allocation5], 1 }

</bundles_post_ra>
